<compile_context>
chip_gen: v7x
topology: tpu7x:2x2x1
jax: 0.10.0
libtpu: 0.0.40
codegen_flags: <defaults>
</compile_context>

<pallas_src>
import jax
import jax.numpy as jnp
from jax.experimental import pallas as pl
from jax.experimental.pallas import tpu as pltpu

IN_FEATURES = 2000          # fixed by the module (nn.Linear(2000, ...))
FEATURE_NUM = 32            # cfg.FUSION_HEAD.FEATURE_NUM (synthetic config)


def _linear_relu_kernel(x_ref, w_ref, b_ref, o_ref):
    # x_ref: (TB, 2000) f32  -- raw feature tile, cast to bf16 in-kernel (VPU)
    # w_ref: (2000, N)  bf16 -- VMEM-resident across the whole grid
    # b_ref: (1, N)     f32
    # o_ref: (TB, N)    f32  -- un-padded output, stored directly
    x = x_ref[...].astype(jnp.bfloat16)
    y = jnp.dot(x, w_ref[...], preferred_element_type=jnp.float32)
    o_ref[...] = jnp.maximum(y + b_ref[...], 0.0)


def psd_forward(feature, weight_t, bias, *, block_b=1024):
    """feature: (B, 2000) f32; weight_t: (2000, N) f32; bias: (N,) f32."""
    B, K = feature.shape
    K2, N = weight_t.shape
    assert K == K2 == IN_FEATURES
    assert bias.shape == (N,)

    # Parameters are tiny (2000 x N): one-time bf16 cast / reshape only.
    w = weight_t.astype(jnp.bfloat16)            # (K, N)
    b2 = bias.astype(jnp.float32).reshape(1, N)  # (1, N)

    # Batch tiling:
    #  * tb = roundup(ceil(B / num_tiles), 8) so an unlucky B (e.g. 520) never
    #    pads by nearly a whole tile,
    #  * force >= 2 grid steps for B >= 128 so the "parallel" batch axis can
    #    shard across the two v7x TensorCores,
    #  * block_b=1024 keeps the double-buffered f32 x-tiles at ~16 MiB, which
    #    fits all generations under the explicit 32 MiB VMEM limit
    #    (v6e can push block_b=2048 with vmem_limit_bytes raised to ~40 MiB).
    num_tiles = pl.cdiv(B, block_b)
    if num_tiles < 2 and B >= 128:
        num_tiles = 2
    tb = ((pl.cdiv(B, num_tiles) + 7) // 8) * 8
    b_pad = num_tiles * tb

    x = feature
    if b_pad != B:                               # copy only when truly needed
        x = jnp.pad(feature, ((0, b_pad - B), (0, 0)))

    out = pl.pallas_call(
        _linear_relu_kernel,
        out_shape=jax.ShapeDtypeStruct((b_pad, N), jnp.float32),
        grid=(num_tiles,),
        in_specs=[
            pl.BlockSpec((tb, K), lambda i: (i, 0)),   # x: tiled over batch
            pl.BlockSpec((K, N), lambda i: (0, 0)),    # weight: VMEM-resident
            pl.BlockSpec((1, N), lambda i: (0, 0)),    # bias:   VMEM-resident
        ],
        out_specs=pl.BlockSpec((tb, N), lambda i: (i, 0)),
        compiler_params=pltpu.CompilerParams(
            dimension_semantics=("parallel",),         # megacore on v7x
            vmem_limit_bytes=32 * 1024 * 1024,
        ),
    )(x, w, b2)

    return out[:B] if b_pad != B else out


def psd_reference(feature, weight_t, bias):
    # True f32 nn.Linear + ReLU numerics (HIGHEST forces the full-f32 matmul).
    y = jnp.dot(feature, weight_t, precision=jax.lax.Precision.HIGHEST)
    return jnp.maximum(y + bias[None, :].astype(jnp.float32), 0.0)


if __name__ == "__main__":
    key = jax.random.PRNGKey(0)
    k_x, k_w, k_b = jax.random.split(key, 3)

    batch = 2
    feature = jax.random.normal(k_x, (batch, IN_FEATURES), dtype=jnp.float32)

    # Deterministic init matching nn.Linear's uniform(-1/sqrt(K), 1/sqrt(K)).
    bound = 1.0 / (IN_FEATURES ** 0.5)
    weight = jax.random.uniform(k_w, (FEATURE_NUM, IN_FEATURES),
                                minval=-bound, maxval=bound, dtype=jnp.float32)
    bias = jax.random.uniform(k_b, (FEATURE_NUM,),
                              minval=-bound, maxval=bound, dtype=jnp.float32)
    weight_t = weight.T  # (K, N) layout for the kernel

    out = jax.block_until_ready(psd_forward(feature, weight_t, bias))

    ref = psd_reference(feature, weight_t, bias)
    assert out.shape == (batch, FEATURE_NUM)
    # Kernel uses bf16 inputs with f32 accumulation; vs the true f32 reference
    # the rounding error over K=2000 terms is ~1e-3 typical, so 1e-2 leaves
    # >10 sigma of deterministic margin.
    assert jnp.allclose(out, ref, atol=1e-2, rtol=1e-2), (
        float(jnp.max(jnp.abs(out - ref))))

    print("KERNEL_OK")
</pallas_src>

<mosaic_0001>
module attributes {stable_mosaic.version = 11 : i64} {
  func.func @_linear_relu_kernel(%arg0: i32, %arg1: memref<8x2000xf32, #tpu.memory_space<vmem>>, %arg2: memref<2000x32xbf16, #tpu.memory_space<vmem>>, %arg3: memref<1x32xf32, #tpu.memory_space<vmem>>, %arg4: memref<8x32xf32, #tpu.memory_space<vmem>>) attributes {dimension_semantics = [#tpu.dimension_semantics<parallel>], iteration_bounds = array<i64: 1>, scalar_prefetch = 0 : i64, scratch_operands = 0 : i64, tpu.core_type = #tpu.core_type<tc>, window_params = [{transform_indices = @transform_0, window_bounds = array<i64: 8, 2000>}, {pipeline_mode = #tpu.pipeline_mode<synchronous>, transform_indices = @transform_1, window_bounds = array<i64: 2000, 32>}, {pipeline_mode = #tpu.pipeline_mode<synchronous>, transform_indices = @transform_2, window_bounds = array<i64: 1, 32>}, {transform_indices = @transform_3, window_bounds = array<i64: 8, 32>}]} {
    %c0 = arith.constant 0 : index
    %c0_0 = arith.constant 0 : index
    %0 = vector.load %arg1[%c0, %c0_0] : memref<8x2000xf32, #tpu.memory_space<vmem>>, vector<8x2000xf32>
    %1 = arith.truncf %0 : vector<8x2000xf32> to vector<8x2000xbf16>
    %c0_1 = arith.constant 0 : index
    %c0_2 = arith.constant 0 : index
    %2 = vector.load %arg2[%c0_1, %c0_2] : memref<2000x32xbf16, #tpu.memory_space<vmem>>, vector<2000x32xbf16>
    %cst = arith.constant dense<0.000000e+00> : vector<8x32xf32>
    %3 = tpu.matmul %1, %2, %cst {dimension_numbers = #tpu.dot_dimension_numbers<[1], [0], [0], [1], [0, 0, 1, 1], [], []>} : vector<8x2000xbf16>, vector<2000x32xbf16>, vector<8x32xf32> -> vector<8x32xf32>
    %c0_3 = arith.constant 0 : index
    %c0_4 = arith.constant 0 : index
    %4 = vector.load %arg3[%c0_3, %c0_4] : memref<1x32xf32, #tpu.memory_space<vmem>>, vector<1x32xf32>
    %5 = vector.broadcast %4 : vector<1x32xf32> to vector<8x32xf32>
    %6 = arith.addf %3, %5 : vector<8x32xf32>
    %cst_5 = arith.constant 0.000000e+00 : f32
    %7 = vector.broadcast %cst_5 : f32 to vector<8x32xf32>
    %8 = arith.maximumf %6, %7 : vector<8x32xf32>
    %c0_6 = arith.constant 0 : index
    %c0_7 = arith.constant 0 : index
    %9 = vector.load %arg4[%c0_6, %c0_7] : memref<8x32xf32, #tpu.memory_space<vmem>>, vector<8x32xf32>
    tpu.vector_store %arg4[%c0_6, %c0_7], %8 {strides = array<i32>} : memref<8x32xf32, #tpu.memory_space<vmem>>, vector<8x32xf32>,
    return
  }
  func.func @transform_0(%arg0: i32) -> (i32, i32) {
    %c0_i32 = arith.constant 0 : i32
    %c0_i32_0 = arith.constant 0 : i32
    return %arg0, %c0_i32 : i32, i32
  }
  func.func @transform_1(%arg0: i32) -> (i32, i32) {
    %c0_i32 = arith.constant 0 : i32
    %c0_i32_0 = arith.constant 0 : i32
    %c0_i32_1 = arith.constant 0 : i32
    return %c0_i32, %c0_i32_0 : i32, i32
  }
  func.func @transform_2(%arg0: i32) -> (i32, i32) {
    %c0_i32 = arith.constant 0 : i32
    %c0_i32_0 = arith.constant 0 : i32
    %c0_i32_1 = arith.constant 0 : i32
    return %c0_i32, %c0_i32_0 : i32, i32
  }
  func.func @transform_3(%arg0: i32) -> (i32, i32) {
    %c0_i32 = arith.constant 0 : i32
    %c0_i32_0 = arith.constant 0 : i32
    return %arg0, %c0_i32 : i32, i32
  }
}

</mosaic_0001>

<bundles_post_ra>
// kernel: tpu_custom_call.1
= control target key start
LH: loop header
LB: loop body
LE: loop exit
PB: predicated region body
PF: predicated region fallthrough
CT: control target
= control target key end

     0   :  { %vm1055_vm0 = vcmask 654336   ;;  %s2301_s0 = inlined_call_operand.vmem [shape: f32[8,2000], index: 0, kind: input, shape index: {}]   ;;  %s2302_s1 = inlined_call_operand.vmem [shape: bf16[2000,32], index: 1, kind: input, shape index: {}]   ;;  %s2303_s2 = inlined_call_operand.vmem [shape: f32[1,32], index: 2, kind: input, shape index: {}]   ;;  %s2304_s3 = inlined_call_operand.hbm [shape: f32[8,32], index: 3, kind: output, shape index: {}]  }
   0x1   :  { %v1679_v0 = vld [vmem:[%s2302_s1 + $0x40] sm:$0xff]   ;;  %v1683_v4 = vld [vmem:[%s2302_s1 + $0x48] sm:$0xff]   ;;  %v1687_v8 = vld [vmem:[%s2302_s1 + $0x50] sm:$0xff]  }
   0x2   :  { %v1680_v1 = vld [vmem:[%s2302_s1 + $0xc0] sm:$0xff]   ;;  %1523 = vmatprep.subr.bf16.mxu0 %v1679_v0  ;;  %v1684_v5 = vld [vmem:[%s2302_s1 + $0xc8] sm:$0xff]   ;;  %v1688_v9 = vld [vmem:[%s2302_s1 + $0xd0] sm:$0xff]  }
   0x3   :  { %v1681_v2 = vld [vmem:[%s2302_s1] sm:$0xff]   ;;  %1545 = vmatprep.subr.bf16.mxu1 %v1680_v1  ;;  %v1685_v6 = vld [vmem:[%s2302_s1 + $0x8] sm:$0xff]   ;;  %v1689_v10 = vld [vmem:[%s2302_s1 + $0x10] sm:$0xff]  }
   0x4   :  { %v1682_v3 = vld [vmem:[%s2302_s1 + $0x80] sm:$0xff]   ;;  %1524 = vmatpush3.bf16.msra.mxu0 %v1681_v2  ;;  %v1686_v7 = vld [vmem:[%s2302_s1 + $0x88] sm:$0xff]   ;;  %v1690_v11 = vld [vmem:[%s2302_s1 + $0x90] sm:$0xff]  }
   0x5   :  { %1546 = vmatpush3.bf16.msra.mxu1 %v1682_v3  ;;  %1525 = vmatprep.subr.bf16.mxu0 %v1683_v4  ;;  %v1691_v12 = vld [vmem:[%s2302_s1 + $0x58] sm:$0xff]   ;;  %v1695_v16 = vld [vmem:[%s2302_s1 + $0x60] sm:$0xff]   ;;  %v1699_v20 = vld [vmem:[%s2302_s1 + $0x68] sm:$0xff]  }
   0x6   :  { %1547 = vmatprep.subr.bf16.mxu1 %v1684_v5  ;;  %v1692_v13 = vld [vmem:[%s2302_s1 + $0xd8] sm:$0xff]   ;;  %v1696_v17 = vld [vmem:[%s2302_s1 + $0xe0] sm:$0xff]   ;;  %v1700_v21 = vld [vmem:[%s2302_s1 + $0xe8] sm:$0xff]  }
   0x7   :  { %v1693_v14 = vld [vmem:[%s2302_s1 + $0x18] sm:$0xff]   ;;  %v1697_v18 = vld [vmem:[%s2302_s1 + $0x20] sm:$0xff]   ;;  %v1701_v22 = vld [vmem:[%s2302_s1 + $0x28] sm:$0xff]  }
   0x8   :  { %1526 = vmatpush3.bf16.msra.mxu0 %v1685_v6  ;;  %v1694_v15 = vld [vmem:[%s2302_s1 + $0x98] sm:$0xff]   ;;  %v1698_v19 = vld [vmem:[%s2302_s1 + $0xa0] sm:$0xff]   ;;  %v1702_v23 = vld [vmem:[%s2302_s1 + $0xa8] sm:$0xff]  }
   0x9   :  { %1548 = vmatpush3.bf16.msra.mxu1 %v1686_v7  ;;  %1527 = vmatprep.subr.bf16.mxu0 %v1687_v8  ;;  %v1703_v24 = vld [vmem:[%s2302_s1 + $0x70] sm:$0xff]   ;;  %v1707_v28 = vld [vmem:[%s2302_s1 + $0x78] sm:$0xff]   ;;  %v17_v32 = vld [vmem:[%s2301_s0 + $0x8] sm:$0xff] }
   0xa   :  { %1549 = vmatprep.subr.bf16.mxu1 %v1688_v9  ;;  %v1704_v25 = vld [vmem:[%s2302_s1 + $0xf0] sm:$0xff]   ;;  %v1708_v29 = vld [vmem:[%s2302_s1 + $0xf8] sm:$0xff]   ;;  %v16_v34 = vld [vmem:[%s2301_s0] sm:$0xff]  ;;  %v33_v35 = vpack.c.bf16 %v17_v32, %v17_v32 }
   0xb   :  { %v1705_v26 = vld [vmem:[%s2302_s1 + $0x30] sm:$0xff]   ;;  %v1709_v30 = vld [vmem:[%s2302_s1 + $0x38] sm:$0xff]   ;;  %v32_v37 = vpack.c.bf16 %v16_v34, %v16_v34  ;;  %v1711_v40 = vld [vmem:[%s2302_s1 + $0x140] sm:$0xff]  }
   0xc   :  { %1528 = vmatpush3.bf16.msra.mxu0 %v1689_v10  ;;  %v1706_v27 = vld [vmem:[%s2302_s1 + $0xb0] sm:$0xff]   ;;  %v1710_v31 = vld [vmem:[%s2302_s1 + $0xb8] sm:$0xff]   ;;  %1091 = vmatprep.mubr.bf16.mxu0 %v33_v35  ;;  %v1712_v41 = vld [vmem:[%s2302_s1 + $0x1c0] sm:$0xff]  }
   0xd   :  { %1550 = vmatpush3.bf16.msra.mxu1 %v1690_v11  ;;  %1529 = vmatprep.subr.bf16.mxu0 %v1691_v12  ;;  %v19_v33 = vld [vmem:[%s2301_s0 + $0x18] sm:$0xff]  ;;  %v18_v38 = vld [vmem:[%s2301_s0 + $0x10] sm:$0xff]  ;;  %v1713_v42 = vld [vmem:[%s2302_s1 + $0x100] sm:$0xff]  }
   0xe   :  { %1551 = vmatprep.subr.bf16.mxu1 %v1692_v13  ;;  %v35_v36 = vpack.c.bf16 %v19_v33, %v19_v33  ;;  %v34_v39 = vpack.c.bf16 %v18_v38, %v18_v38  ;;  %v1714_v43 = vld [vmem:[%s2302_s1 + $0x180] sm:$0xff]   ;;  %v1715_v44 = vld [vmem:[%s2302_s1 + $0x148] sm:$0xff]   ;;  %v1719_v48 = vld [vmem:[%s2302_s1 + $0x150] sm:$0xff]  }
   0xf   :  { %v1716_v45 = vld [vmem:[%s2302_s1 + $0x1c8] sm:$0xff]   ;;  %v1720_v49 = vld [vmem:[%s2302_s1 + $0x1d0] sm:$0xff]   ;;  %v1723_v52 = vld [vmem:[%s2302_s1 + $0x158] sm:$0xff]  }
  0x10   :  { %1530 = vmatpush3.bf16.msra.mxu0 %v1693_v14  ;;  %1131 = vmatprep.mubr.bf16.mxu1 %v35_v36  ;;  %v1717_v46 = vld [vmem:[%s2302_s1 + $0x108] sm:$0xff]   ;;  %v1721_v50 = vld [vmem:[%s2302_s1 + $0x110] sm:$0xff]   ;;  %v1724_v53 = vld [vmem:[%s2302_s1 + $0x1d8] sm:$0xff]  }
  0x11   :  { %1552 = vmatpush3.bf16.msra.mxu1 %v1694_v15  ;;  %1531 = vmatprep.subr.bf16.mxu0 %v1695_v16  ;;  %v1718_v47 = vld [vmem:[%s2302_s1 + $0x188] sm:$0xff]   ;;  %v1722_v51 = vld [vmem:[%s2302_s1 + $0x190] sm:$0xff]   ;;  %v1725_v54 = vld [vmem:[%s2302_s1 + $0x118] sm:$0xff]  }
  0x12   :  { %1553 = vmatprep.subr.bf16.mxu1 %v1696_v17  ;;  %v1726_v55 = vld [vmem:[%s2302_s1 + $0x198] sm:$0xff]   ;;  %v1727_v56 = vld [vmem:[%s2302_s1 + $0x160] sm:$0xff]   ;;  %v1731_v60 = vld [vmem:[%s2302_s1 + $0x168] sm:$0xff]  }
  0x13   :  { %v1728_v57 = vld [vmem:[%s2302_s1 + $0x1e0] sm:$0xff]   ;;  %v1732_v61 = vld [vmem:[%s2302_s1 + $0x1e8] sm:$0xff]   ;;  %v1735_v0 = vld [vmem:[%s2302_s1 + $0x170] sm:$0xff]  }
  0x14   :  { %1532 = vmatpush3.bf16.msra.mxu0 %v1697_v18  ;;  %v1729_v58 = vld [vmem:[%s2302_s1 + $0x120] sm:$0xff]   ;;  %v1733_v62 = vld [vmem:[%s2302_s1 + $0x128] sm:$0xff]   ;;  %v1736_v1 = vld [vmem:[%s2302_s1 + $0x1f0] sm:$0xff]  }
  0x15   :  { %1554 = vmatpush3.bf16.msra.mxu1 %v1698_v19  ;;  %1533 = vmatprep.subr.bf16.mxu0 %v1699_v20  ;;  %v1730_v59 = vld [vmem:[%s2302_s1 + $0x1a0] sm:$0xff]   ;;  %v1734_v63 = vld [vmem:[%s2302_s1 + $0x1a8] sm:$0xff]   ;;  %v1737_v2 = vld [vmem:[%s2302_s1 + $0x130] sm:$0xff]  }
  0x16   :  { %1555 = vmatprep.subr.bf16.mxu1 %v1700_v21  ;;  %v1738_v3 = vld [vmem:[%s2302_s1 + $0x1b0] sm:$0xff]   ;;  %v1739_v4 = vld [vmem:[%s2302_s1 + $0x178] sm:$0xff]   ;;  %v21_v8 = vld [vmem:[%s2301_s0 + $0x28] sm:$0xff] }
  0x17   :  { %v1740_v5 = vld [vmem:[%s2302_s1 + $0x1f8] sm:$0xff]   ;;  %v37_v10 = vpack.c.bf16 %v21_v8, %v21_v8  ;;  %v20_v12 = vld [vmem:[%s2301_s0 + $0x20] sm:$0xff]  ;;  %v22_v13 = vld [vmem:[%s2301_s0 + $0x30] sm:$0xff] }
  0x18   :  { %1534 = vmatpush3.bf16.msra.mxu0 %v1701_v22  ;;  %v1741_v6 = vld [vmem:[%s2302_s1 + $0x138] sm:$0xff]   ;;  %v36_v14 = vpack.c.bf16 %v20_v12, %v20_v12  ;;  %v38_v15 = vpack.c.bf16 %v22_v13, %v22_v13  ;;  %v1743_v16 = vld [vmem:[%s2302_s1 + $0x240] sm:$0xff]   ;;  %v1747_v20 = vld [vmem:[%s2302_s1 + $0x248] sm:$0xff]  }
  0x19   :  { %1556 = vmatpush3.bf16.msra.mxu1 %v1702_v23  ;;  %1535 = vmatprep.subr.bf16.mxu0 %v1703_v24  ;;  %v1742_v7 = vld [vmem:[%s2302_s1 + $0x1b8] sm:$0xff]   ;;  %v1744_v17 = vld [vmem:[%s2302_s1 + $0x2c0] sm:$0xff]   ;;  %v1748_v21 = vld [vmem:[%s2302_s1 + $0x2c8] sm:$0xff]  }
  0x1a   :  { %1557 = vmatprep.subr.bf16.mxu1 %v1704_v25  ;;  %v23_v9 = vld [vmem:[%s2301_s0 + $0x38] sm:$0xff]  ;;  %v1745_v18 = vld [vmem:[%s2302_s1 + $0x200] sm:$0xff]   ;;  %v1749_v22 = vld [vmem:[%s2302_s1 + $0x208] sm:$0xff]  }
  0x1b   :  { %v39_v11 = vpack.c.bf16 %v23_v9, %v23_v9  ;;  %v1746_v19 = vld [vmem:[%s2302_s1 + $0x280] sm:$0xff]   ;;  %v1750_v23 = vld [vmem:[%s2302_s1 + $0x288] sm:$0xff]   ;;  %v1751_v24 = vld [vmem:[%s2302_s1 + $0x250] sm:$0xff]  }
  0x1c   :  { %1536 = vmatpush3.bf16.msra.mxu0 %v1705_v26  ;;  %v1752_v25 = vld [vmem:[%s2302_s1 + $0x2d0] sm:$0xff]   ;;  %v1759_v32 = vld [vmem:[%s2302_s1 + $0x260] sm:$0xff]   ;;  %v1763_v36 = vld [vmem:[%s2302_s1 + $0x268] sm:$0xff]  }
  0x1d   :  { %1558 = vmatpush3.bf16.msra.mxu1 %v1706_v27  ;;  %1537 = vmatprep.subr.bf16.mxu0 %v1707_v28  ;;  %v1753_v26 = vld [vmem:[%s2302_s1 + $0x210] sm:$0xff]   ;;  %v1755_v28 = vld [vmem:[%s2302_s1 + $0x258] sm:$0xff]   ;;  %v1760_v33 = vld [vmem:[%s2302_s1 + $0x2e0] sm:$0xff]  }
  0x1e   :  { %1559 = vmatprep.subr.bf16.mxu1 %v1708_v29  ;;  %v1754_v27 = vld [vmem:[%s2302_s1 + $0x290] sm:$0xff]   ;;  %v1756_v29 = vld [vmem:[%s2302_s1 + $0x2d8] sm:$0xff]   ;;  %v1761_v34 = vld [vmem:[%s2302_s1 + $0x220] sm:$0xff]  }
  0x1f   :  { %v1762_v35 = vld [vmem:[%s2302_s1 + $0x2a0] sm:$0xff]   ;;  %v1765_v38 = vld [vmem:[%s2302_s1 + $0x228] sm:$0xff]   ;;  %v1794_v12 = vld [vmem:[%s2302_s1 + $0x330] sm:$0xff]  }
  0x20   :  { %1538 = vmatpush3.bf16.msra.mxu0 %v1709_v30  ;;  %v1757_v30 = vld [vmem:[%s2302_s1 + $0x218] sm:$0xff]   ;;  %v1790_v8 = vld [vmem:[%s2302_s1 + $0x368] sm:$0xff]   ;;  %v1795_v13 = vld [vmem:[%s2302_s1 + $0x3b0] sm:$0xff]  }
  0x21   :  { %1560 = vmatpush3.bf16.msra.mxu1 %v1710_v31  ;;  %1567 = vmatprep.subr.bf16.mxu0 %v1711_v40  ;;  %v1758_v31 = vld [vmem:[%s2302_s1 + $0x298] sm:$0xff]   ;;  %v1767_v40 = vld [vmem:[%s2302_s1 + $0x270] sm:$0xff]   ;;  %v1791_v9 = vld [vmem:[%s2302_s1 + $0x328] sm:$0xff]  }
  0x22   :  { %1589 = vmatprep.subr.bf16.mxu1 %v1712_v41  ;;  %v1768_v41 = vld [vmem:[%s2302_s1 + $0x2f0] sm:$0xff]  }
  0x23   :  { %1092 = vmatmul.mubr.bf16.vlgmr.msra.gmra.mrb[0].mxu0 %v32_v37  ;;  %v1764_v37 = vld [vmem:[%s2302_s1 + $0x2e8] sm:$0xff]  }
  0x24   :  { %1132 = vmatmul.mubr.bf16.vlgmr.msra.gmra.mrb[0].mxu1 %v34_v39  ;;  %1568 = vmatpush3.bf16.msra.mxu0 %v1713_v42  ;;  %v1766_v39 = vld [vmem:[%s2302_s1 + $0x2a8] sm:$0xff]   ;;  %v1769_v42 = vld [vmem:[%s2302_s1 + $0x230] sm:$0xff]  }
  0x25   :  { %1590 = vmatpush3.bf16.msra.mxu1 %v1714_v43  ;;  %1569 = vmatprep.subr.bf16.mxu0 %v1715_v44  ;;  %v1770_v43 = vld [vmem:[%s2302_s1 + $0x2b0] sm:$0xff]   ;;  %v1771_v44 = vld [vmem:[%s2302_s1 + $0x278] sm:$0xff]  }
  0x26   :  { %1591 = vmatprep.subr.bf16.mxu1 %v1716_v45  ;;  %1171 = vmatprep.mubr.bf16.mxu0 %v37_v10  ;;  %v1772_v45 = vld [vmem:[%s2302_s1 + $0x2f8] sm:$0xff]   ;;  %v1792_v10 = vld [vmem:[%s2302_s1 + $0x3a8] sm:$0xff]  }
  0x27   :  { %1211 = vmatprep.mubr.bf16.mxu1 %v39_v11  ;;  %v1793_v11 = vld [vmem:[%s2302_s1 + $0x370] sm:$0xff]  }
  0x28   :  { %1570 = vmatpush3.bf16.msra.mxu0 %v1717_v46  ;;  %v1773_v46 = vld [vmem:[%s2302_s1 + $0x238] sm:$0xff]  }
  0x29   :  { %1592 = vmatpush3.bf16.msra.mxu1 %v1718_v47  ;;  %1571 = vmatprep.subr.bf16.mxu0 %v1719_v48  ;;  %v1774_v47 = vld [vmem:[%s2302_s1 + $0x2b8] sm:$0xff]   ;;  %v25_v48 = vld [vmem:[%s2301_s0 + $0x48] sm:$0xff] }
  0x2a   :  { %1593 = vmatprep.subr.bf16.mxu1 %v1720_v49  ;;  %v41_v49 = vpack.c.bf16 %v25_v48, %v25_v48 }
  0x2c   :  { %1572 = vmatpush3.bf16.msra.mxu0 %v1721_v50  ;;  %v27_v50 = vld [vmem:[%s2301_s0 + $0x58] sm:$0xff] }
  0x2d   :  { %1594 = vmatpush3.bf16.msra.mxu1 %v1722_v51  ;;  %1573 = vmatprep.subr.bf16.mxu0 %v1723_v52  ;;  %v24_v51 = vld [vmem:[%s2301_s0 + $0x40] sm:$0xff]  ;;  %v26_v52 = vld [vmem:[%s2301_s0 + $0x50] sm:$0xff] }
  0x2e   :  { %1595 = vmatprep.subr.bf16.mxu1 %v1724_v53  ;;  %v43_v53 = vpack.c.bf16 %v27_v50, %v27_v50 }
  0x30   :  { %1574 = vmatpush3.bf16.msra.mxu0 %v1725_v54  ;;  %v40_v54 = vpack.c.bf16 %v24_v51, %v24_v51 }
  0x31   :  { %1596 = vmatpush3.bf16.msra.mxu1 %v1726_v55  ;;  %1575 = vmatprep.subr.bf16.mxu0 %v1727_v56  ;;  %v42_v55 = vpack.c.bf16 %v26_v52, %v26_v52  ;;  %v1775_v56 = vld [vmem:[%s2302_s1 + $0x340] sm:$0xff]  }
  0x32   :  { %1597 = vmatprep.subr.bf16.mxu1 %v1728_v57  ;;  %v1828_v57 = vmov 0  }
  0x34   :  { %1576 = vmatpush3.bf16.msra.mxu0 %v1729_v58  ;;  %v1776_v58 = vld [vmem:[%s2302_s1 + $0x300] sm:$0xff]  }
  0x35   :  { %1598 = vmatpush3.bf16.msra.mxu1 %v1730_v59  ;;  %1577 = vmatprep.subr.bf16.mxu0 %v1731_v60  ;;  %v1777_v59 = vld [vmem:[%s2302_s1 + $0x380] sm:$0xff]   ;;  %v1778_v60 = vld [vmem:[%s2302_s1 + $0x348] sm:$0xff]  }
  0x36   :  { %1599 = vmatprep.subr.bf16.mxu1 %v1732_v61  ;;  %v1779_v61 = vld [vmem:[%s2302_s1 + $0x308] sm:$0xff]  }
  0x38   :  { %1578 = vmatpush3.bf16.msra.mxu0 %v1733_v62  ;;  %v1780_v62 = vld [vmem:[%s2302_s1 + $0x388] sm:$0xff]  }
  0x39   :  { %1600 = vmatpush3.bf16.msra.mxu1 %v1734_v63  ;;  %1579 = vmatprep.subr.bf16.mxu0 %v1735_v0  ;;  %v1781_v63 = vld [vmem:[%s2302_s1 + $0x350] sm:$0xff]  }
  0x3a   :  { %1601 = vmatprep.subr.bf16.mxu1 %v1736_v1  ;;  %v1782_v0 = vld [vmem:[%s2302_s1 + $0x310] sm:$0xff]  }
  0x3b   :  { %v1783_v1 = vld [vmem:[%s2302_s1 + $0x390] sm:$0xff]  }
  0x3c   :  { %1580 = vmatpush3.bf16.msra.mxu0 %v1737_v2  ;;  %v1784_v2 = vld [vmem:[%s2302_s1 + $0x358] sm:$0xff]  }
  0x3d   :  { %1602 = vmatpush3.bf16.msra.mxu1 %v1738_v3  ;;  %1581 = vmatprep.subr.bf16.mxu0 %v1739_v4  ;;  %v1785_v3 = vld [vmem:[%s2302_s1 + $0x318] sm:$0xff]  }
  0x3e   :  { %1603 = vmatprep.subr.bf16.mxu1 %v1740_v5  ;;  %v1786_v4 = vld [vmem:[%s2302_s1 + $0x398] sm:$0xff]   ;;  %v1787_v5 = vld [vmem:[%s2302_s1 + $0x360] sm:$0xff]  }
  0x40   :  { %1582 = vmatpush3.bf16.msra.mxu0 %v1741_v6  ;;  %v1788_v6 = vld [vmem:[%s2302_s1 + $0x320] sm:$0xff]  }
  0x41   :  { %1604 = vmatpush3.bf16.msra.mxu1 %v1742_v7  ;;  %1611 = vmatprep.subr.bf16.mxu0 %v1743_v16  ;;  %v1789_v7 = vld [vmem:[%s2302_s1 + $0x3a0] sm:$0xff]  }
  0x42   :  { %1633 = vmatprep.subr.bf16.mxu1 %v1744_v17  ;;  %v1797_v17 = vld [vmem:[%s2302_s1 + $0x338] sm:$0xff]  }
  0x43   :  { %1172 = vmatmul.mubr.bf16.vlgmr.msra.gmra.mrb[4].mxu0 %v36_v14  ;;  %v29_v14 = vld [vmem:[%s2301_s0 + $0x68] sm:$0xff] }
  0x44   :  { %1212 = vmatmul.mubr.bf16.vlgmr.msra.gmra.mrb[4].mxu1 %v38_v15  ;;  %1612 = vmatpush3.bf16.msra.mxu0 %v1745_v18  ;;  %v1796_v15 = vld [vmem:[%s2302_s1 + $0x378] sm:$0xff]   ;;  %v45_v16 = vpack.c.bf16 %v29_v14, %v29_v14 }
  0x45   :  { %1634 = vmatpush3.bf16.msra.mxu1 %v1746_v19  ;;  %1613 = vmatprep.subr.bf16.mxu0 %v1747_v20  ;;  %v1798_v18 = vld [vmem:[%s2302_s1 + $0x3b8] sm:$0xff]   ;;  %v28_v19 = vld [vmem:[%s2301_s0 + $0x60] sm:$0xff] }
  0x46   :  { %1635 = vmatprep.subr.bf16.mxu1 %v1748_v21  ;;  %1251 = vmatprep.mubr.bf16.mxu0 %v41_v49  ;;  %v31_v20 = vld [vmem:[%s2301_s0 + $0x78] sm:$0xff] }
  0x47   :  { %1291 = vmatprep.mubr.bf16.mxu1 %v43_v53  ;;  %v47_v21 = vpack.c.bf16 %v31_v20, %v31_v20 }
  0x48   :  { %1614 = vmatpush3.bf16.msra.mxu0 %v1749_v22 }
  0x49   :  { %1636 = vmatpush3.bf16.msra.mxu1 %v1750_v23  ;;  %1615 = vmatprep.subr.bf16.mxu0 %v1751_v24 }
  0x4a   :  { %1637 = vmatprep.subr.bf16.mxu1 %v1752_v25 }
  0x4c   :  { %1616 = vmatpush3.bf16.msra.mxu0 %v1753_v26 }
  0x4d   :  { %1638 = vmatpush3.bf16.msra.mxu1 %v1754_v27  ;;  %1617 = vmatprep.subr.bf16.mxu0 %v1755_v28 }
  0x4e   :  { %1639 = vmatprep.subr.bf16.mxu1 %v1756_v29 }
  0x50   :  { %1618 = vmatpush3.bf16.msra.mxu0 %v1757_v30 }
  0x51   :  { %1640 = vmatpush3.bf16.msra.mxu1 %v1758_v31  ;;  %1619 = vmatprep.subr.bf16.mxu0 %v1759_v32 }
  0x52   :  { %1641 = vmatprep.subr.bf16.mxu1 %v1760_v33 }
  0x54   :  { %1620 = vmatpush3.bf16.msra.mxu0 %v1761_v34 }
  0x55   :  { %1642 = vmatpush3.bf16.msra.mxu1 %v1762_v35  ;;  %1621 = vmatprep.subr.bf16.mxu0 %v1763_v36 }
  0x56   :  { %1643 = vmatprep.subr.bf16.mxu1 %v1764_v37 }
  0x58   :  { %1622 = vmatpush3.bf16.msra.mxu0 %v1765_v38 }
  0x59   :  { %1644 = vmatpush3.bf16.msra.mxu1 %v1766_v39  ;;  %1623 = vmatprep.subr.bf16.mxu0 %v1767_v40 }
  0x5a   :  { %1645 = vmatprep.subr.bf16.mxu1 %v1768_v41 }
  0x5c   :  { %1624 = vmatpush3.bf16.msra.mxu0 %v1769_v42 }
  0x5d   :  { %1646 = vmatpush3.bf16.msra.mxu1 %v1770_v43  ;;  %1625 = vmatprep.subr.bf16.mxu0 %v1771_v44 }
  0x5e   :  { %1647 = vmatprep.subr.bf16.mxu1 %v1772_v45 }
  0x60   :  { %1626 = vmatpush3.bf16.msra.mxu0 %v1773_v46 }
  0x61   :  { %1648 = vmatpush3.bf16.msra.mxu1 %v1774_v47  ;;  %1655 = vmatprep.subr.bf16.mxu0 %v1775_v56 }
  0x62   :  { %1339 = vmatprep.subr.bf16.mxu1 %v1828_v57 }
  0x63   :  { %1252 = vmatmul.mubr.bf16.vlgmr.msra.gmra.mrb[8].mxu0 %v40_v54 }
  0x64   :  { %1292 = vmatmul.mubr.bf16.vlgmr.msra.gmra.mrb[8].mxu1 %v42_v55  ;;  %1656 = vmatpush3.bf16.msra.mxu0 %v1776_v58 }
  0x65   :  { %1340 = vmatpush1.bf16.msra.mxu1 %v1777_v59  ;;  %1657 = vmatprep.subr.bf16.mxu0 %v1778_v60 }
  0x66   :  { %1341 = vmatprep.subr.bf16.mxu1 %v1828_v57  ;;  %1331 = vmatprep.mubr.bf16.mxu0 %v45_v16 }
  0x68   :  { %1658 = vmatpush3.bf16.msra.mxu0 %v1779_v61 }
  0x69   :  { %1342 = vmatpush1.bf16.msra.mxu1 %v1780_v62  ;;  %1659 = vmatprep.subr.bf16.mxu0 %v1781_v63 }
  0x6a   :  { %1343 = vmatprep.subr.bf16.mxu1 %v1828_v57 }
  0x6c   :  { %1660 = vmatpush3.bf16.msra.mxu0 %v1782_v0 }
  0x6d   :  { %1344 = vmatpush1.bf16.msra.mxu1 %v1783_v1  ;;  %1661 = vmatprep.subr.bf16.mxu0 %v1784_v2 }
  0x6e   :  { %1345 = vmatprep.subr.bf16.mxu1 %v1828_v57 }
  0x70   :  { %1662 = vmatpush3.bf16.msra.mxu0 %v1785_v3 }
  0x71   :  { %1346 = vmatpush1.bf16.msra.mxu1 %v1786_v4  ;;  %1663 = vmatprep.subr.bf16.mxu0 %v1787_v5 }
  0x72   :  { %1347 = vmatprep.subr.bf16.mxu1 %v1828_v57 }
  0x74   :  { %1664 = vmatpush3.bf16.msra.mxu0 %v1788_v6 }
  0x75   :  { %1348 = vmatpush1.bf16.msra.mxu1 %v1789_v7  ;;  %1665 = vmatprep.subr.bf16.mxu0 %v1790_v8 }
  0x76   :  { %1349 = vmatprep.subr.bf16.mxu1 %v1828_v57 }
  0x78   :  { %1666 = vmatpush3.bf16.msra.mxu0 %v1791_v9 }
  0x79   :  { %1350 = vmatpush1.bf16.msra.mxu1 %v1792_v10  ;;  %1667 = vmatprep.subr.bf16.mxu0 %v1793_v11 }
  0x7a   :  { %1351 = vmatprep.subr.bf16.mxu1 %v1828_v57 }
  0x7c   :  { %1668 = vmatpush3.bf16.msra.mxu0 %v1794_v12 }
  0x7d   :  { %1352 = vmatpush1.bf16.msra.mxu1 %v1795_v13  ;;  %1669 = vmatprep.subr.bf16.mxu0 %v1796_v15 }
  0x7e   :  { %1353 = vmatprep.subr.bf16.mxu1 %v1828_v57 }
  0x7f   :  { %8 = vsyncpa [#allocation3], 0  ;;  %v44_v22 = vpack.c.bf16 %v28_v19, %v28_v19  ;;  %v1799_v23 = vld [vmem:[%s2302_s1 + $0x3c0] sm:$0xff]   ;;  %1522 = vmatprep.mubr.msk.bf16.mxu1 %vm1055_vm0, %v47_v21  ;;  %v1800_v24 = vld [vmem:[%s2302_s1 + $0x3c8] sm:$0xff]   ;;  %vm1380_vm1 = vcmask 261120  }
  0x80   :  { %1670 = vmatpush3.bf16.msra.mxu0 %v1797_v17  ;;  %v1801_v25 = vld [vmem:[%s2302_s1 + $0x3d0] sm:$0xff]   ;;  %v1802_v26 = vld [vmem:[%s2302_s1 + $0x3d8] sm:$0xff]   ;;  %v1803_v27 = vld [vmem:[%s2302_s1 + $0x3e0] sm:$0xff]  }
  0x81   :  { %1354 = vmatpush1.bf16.msra.mxu1 %v1798_v18  ;;  %v30_v28 = vld [vmem:[%s2301_s0 + $0x70] sm:$0xff]  ;;  %v1396_v32 = vld [vmem:[%s2303_s2] ss:$0 sm:$0xff]  ;;  %s1829_s0 = smov [#allocation2]  }
  0x82   :  { %1355 = vmatprep.subr.bf16.mxu1 %v1828_v57  ;;  %v46_v29 = vpack.c.bf16 %v30_v28, %v30_v28  ;;  %s1388_s1 = sshll.u32 %s1829_s0, 4  ;;  %s1389_s1 = int_to_ptr.vmem [resolvable:$true] %s1388_s1 }
  0x83   :  { %1332 = vmatmul.mubr.bf16.vlgmr.msra.gmra.mrb[12].mxu0 %v44_v22  ;;  %s1804_s2 = scalar_lea.vmem %s1389_s1, 128  ;;  %p1809_p1 = scmp.lt.s32.totalorder %s1389_s1, %s1389_s1 }
  0x84   :  { %p1805_p0 = scmp.ne.s32.totalorder %s1389_s1, %s1804_s2  ;;  %p1810_p2 = scmp.lt.s32.totalorder %s1804_s2, %s1804_s2 }
  0x85   :  { %1356 = vmatpush1.bf16.msra.mxu1 %v1799_v23 }
  0x86   :  { %1357 = vmatprep.subr.bf16.mxu1 %v1828_v57  ;;  %p1811_p3 = por %p1810_p2, %p1809_p1 }
  0x88   :  { %p1812_p4 = pnand %p1811_p3, %p1805_p0 }
  0x89   :  { %1358 = vmatpush1.bf16.msra.mxu1 %v1800_v24 }
  0x8a   :  { %1359 = vmatprep.subr.bf16.mxu1 %v1828_v57 }
  0x8d   :  { %1360 = vmatpush1.bf16.msra.mxu1 %v1801_v25 }
  0x8e   :  { %1361 = vmatprep.subr.bf16.mxu1 %v1828_v57 }
  0x91   :  { %1362 = vmatpush1.bf16.msra.mxu1 %v1802_v26 }
  0x92   :  { %1363 = vmatprep.subr.bf16.mxu1 %v1828_v57 }
  0x95   :  { %1364 = vmatpush1.bf16.msra.mxu1 %v1803_v27 }
  0x98   :  { %1372 = vmatmul.mubr.bf16.vlgmr.msra.gmra.mrb[12].mxu1 %v46_v29 }
  0xf6   :  { %v1539_v30 = vpop.f32.mrb[0].mxu0 }
  0xf7   :  { %v1561_v31 = vpop.f32.mrb[0].mxu1  ;;  %v1540_v33 = vpop.f32.mrb[1].mxu0 }
  0xf8   :  { %v1562_v34 = vpop.f32.mrb[1].mxu1  ;;  %v1541_v35 = vadd.f32 %v1540_v33, %v1539_v30  ;;  %v1542_v38 = vpop.f32.mrb[2].mxu0 }
  0xf9   :  { %v1563_v36 = vadd.f32 %v1562_v34, %v1561_v31  ;;  %v1564_v37 = vpop.f32.mrb[2].mxu1  ;;  %v1543_v40 = vpop.f32.mrb[3].mxu0 }
  0xfa   :  { %v1565_v39 = vpop.f32.mrb[3].mxu1  ;;  %v1094_v41 = vadd.f32 %v1541_v35, %v1396_v32 }
  0xfc   :  { %v1134_v42 = vadd.f32 %v1563_v36, %v1094_v41 }
 0x116   :  { %v1583_v43 = vpop.f32.mrb[4].mxu0 }
 0x117   :  { %v1605_v44 = vpop.f32.mrb[4].mxu1  ;;  %v1584_v45 = vpop.f32.mrb[5].mxu0 }
 0x118   :  { %v1585_v46 = vadd.f32 %v1584_v45, %v1583_v43  ;;  %v1606_v47 = vpop.f32.mrb[5].mxu1  ;;  %v1586_v48 = vpop.f32.mrb[6].mxu0 }
 0x119   :  { %v1607_v49 = vadd.f32 %v1606_v47, %v1605_v44  ;;  %v1608_v50 = vpop.f32.mrb[6].mxu1  ;;  %v1587_v51 = vpop.f32.mrb[7].mxu0 }
 0x11a   :  { %v1174_v52 = vadd.f32 %v1585_v46, %v1134_v42  ;;  %v1609_v53 = vpop.f32.mrb[7].mxu1 }
 0x11c   :  { %v1214_v54 = vadd.f32 %v1607_v49, %v1174_v52 }
 0x136   :  { %v1627_v55 = vpop.f32.mrb[8].mxu0 }
 0x137   :  { %v1649_v56 = vpop.f32.mrb[8].mxu1  ;;  %v1628_v57 = vpop.f32.mrb[9].mxu0 }
 0x138   :  { %v1629_v58 = vadd.f32 %v1628_v57, %v1627_v55  ;;  %v1650_v59 = vpop.f32.mrb[9].mxu1  ;;  %v1630_v60 = vpop.f32.mrb[10].mxu0 }
 0x139   :  { %v1651_v61 = vadd.f32 %v1650_v59, %v1649_v56  ;;  %v1652_v62 = vpop.f32.mrb[10].mxu1  ;;  %v1631_v63 = vpop.f32.mrb[11].mxu0 }
 0x13a   :  { %v1254_v0 = vadd.f32 %v1629_v58, %v1214_v54  ;;  %v1653_v1 = vpop.f32.mrb[11].mxu1 }
 0x13c   :  { %v1294_v2 = vadd.f32 %v1651_v61, %v1254_v0 }
 0x156   :  { %v1671_v3 = vpop.f32.mrb[12].mxu0 }
 0x157   :  { %v1672_v4 = vpop.f32.mrb[13].mxu0 }
 0x158   :  { %v1673_v5 = vadd.f32 %v1672_v4, %v1671_v3  ;;  %v1674_v6 = vpop.f32.mrb[14].mxu0 }
 0x159   :  { %v1675_v7 = vpop.f32.mrb[15].mxu0 }
 0x15a   :  { %v1334_v8 = vadd.f32 %v1673_v5, %v1294_v2 }
 0x16b   :  { %v1373_v9 = vpop.f32.mrb[12].mxu1 }
 0x16c   :  { %v1374_v10 = vadd.f32 %v1373_v9, %v1334_v8  ;;  %v1375_v11 = vpop.f32.mrb[13].mxu1 }
 0x16d   :  { %v1376_v12 = vpop.f32.mrb[14].mxu1 }
 0x16e   :  { %v1379_v13 = vmax.f32 %v1374_v10, 0.0  ;;  %v1377_v14 = vpop.f32.mrb[15].mxu1 }
 0x170   :  { %1381 = vst.msk [vmem:[#allocation2] sm:$0xff] %vm1380_vm1, %v1379_v13 }
 0x171   :  { %1815 = shalt.err (!%p1812_p4)
}
 0x172   :  { %s1816_s28 = scalar_lea.hbm %s2304_s3, 128 }
 0x173   :  { %p1817_p5 = scmp.ne.s32.totalorder %s2304_s3, %s1816_s28  ;;  %p1820_p6 = scmp.lt.u32.totalorder %s1816_s28, %s2304_s3 }
 0x175   :  { %p1822_p7 = pnand %p1820_p6, %p1817_p5 }
 0x177   :  { %1825 = shalt.err (!%p1822_p7)
}
 0x178   :  { %1391 = dma.vmem_to_hbm [thread:$0]  %s1389_s1, 128, %s2304_s3, [#allocation3]  }
 0x179   :  { %1826 = dma.done.wait [#allocation3], 128  }
 0x17a   :  { %1827 = vsyncadd [#allocation3], 4294967168 }
 0x17b   :  { %1395 = vsyncpa [#allocation3], 1 }

</bundles_post_ra>
